<compile_context>
chip_gen: v7x
topology: tpu7x:2x2x1
jax: 0.10.0
libtpu: 0.0.40
codegen_flags: <defaults>
</compile_context>

<pallas_src>
import functools
import math

import jax
import jax.numpy as jnp
import numpy as np
from jax.experimental import pallas as pl
from jax.experimental.pallas import tpu as pltpu


def _windowed_copy_kernel(*refs, n_sel, label):
    """Aligned fast path.  refs = (x_win_0, ..., x_win_{n_sel-1}, out_ref).
    Each x_win_k is the (tile_R, out_len) window already gathered by its
    BlockSpec DMA; the body is a pure VMEM copy plus one constant fill."""
    o_ref = refs[n_sel]
    for k in range(n_sel):
        o_ref[k] = refs[k][...]
    o_ref[n_sel] = jnp.full(o_ref.shape[1:], label, o_ref.dtype)


def _resident_copy_kernel(x_ref, o_ref, *, starts, out_len, label):
    """General fallback.  Full (tile_R, T) row slab resident; windows are
    extracted with static slices (the starts are Python ints), so no dynamic
    lane slicing and no scalar prefetch are needed."""
    for k, s in enumerate(starts):
        o_ref[k] = x_ref[:, s:s + out_len]
    o_ref[len(starts)] = jnp.full(o_ref.shape[1:], label, o_ref.dtype)


def _pick_row_tile(n_rows, bytes_per_row, budget_bytes=12 * 1024 * 1024):
    """Largest row tile that (a) divides n_rows, (b) is a multiple of 8 (or is
    n_rows itself -> 'equal to full dim' BlockSpec rule), and (c) keeps the
    double-buffered working set under a budget sized for v7x VMEM."""
    if n_rows % 8 != 0 or n_rows * bytes_per_row <= budget_bytes:
        return n_rows
    best = 8
    t = 8
    while t < n_rows:
        if n_rows % t == 0 and t * bytes_per_row <= budget_bytes:
            best = t
        t += 8
    return best


def chunk_shuffle_label(x, chunk_order, label,
                        sampling_rate=None, chunk_size=None,
                        number_of_chunks=None):
    """JAX/Pallas equivalent of ChunkShuffleLabel.forward.

    Returns an array of shape (len(chunk_order) + 1, *x.shape[:-1], out_len)
    where out_len = min(chunk_len, total_length), matching torch.stack(chunks).
    """
    if sampling_rate is None and chunk_size is None and number_of_chunks is None:
        raise ValueError("sampling_rate, chunk_size and number_of_chunks "
                         "cannot be None together.")
    # Only validate against number_of_chunks when it is given (review fix:
    # avoid dereferencing None when sampling_rate/chunk_size fully specify it).
    if number_of_chunks is not None:
        invalid = [i for i in chunk_order if i < 0 or i >= number_of_chunks]
        if invalid:
            raise ValueError(f"Invalid chunk order {invalid}.")
    if len(chunk_order) == 0:
        raise ValueError("chunk_order must contain at least one chunk index.")

    total_length = x.shape[-1]

    # Parameter-inference logic identical to the module (static, Python-side).
    if sampling_rate is None and chunk_size is None:
        sampling_rate = 1
        chunk_size = math.ceil(total_length / number_of_chunks)
    if chunk_size is None and sampling_rate is not None:
        chunk_size = math.ceil(total_length / (number_of_chunks * sampling_rate))
    elif sampling_rate is None and chunk_size is not None:
        sampling_rate = math.ceil(total_length / (number_of_chunks * chunk_size))

    chunk_len = int(chunk_size * sampling_rate)
    # Every selected slice [start:end] has length min(chunk_len, total_length);
    # this also covers the total_length < chunk_len edge case (review fix) so
    # we never read past the end of the input.
    out_len = min(chunk_len, total_length)

    starts = []
    for i in chunk_order:
        end = min(total_length, int((i + 1) * chunk_size * sampling_rate))
        starts.append(max(0, end - chunk_len))
    starts = tuple(int(s) for s in starts)

    n_sel = len(chunk_order)
    n_out = n_sel + 1

    # Flatten all leading dims into one row axis so the kernel is always 2D.
    lead_shape = x.shape[:-1]
    R = int(np.prod(lead_shape)) if lead_shape else 1
    x2d = x.reshape(R, total_length)
    itemsize = np.dtype(x.dtype).itemsize

    # Fast path: every window is 128-lane aligned -> express the window start
    # directly in the input BlockSpec (DMA does the gather for free).
    aligned = (out_len % 128 == 0) and all(s % out_len == 0 for s in starts)

    if aligned:
        # Working set per row: n_sel double-buffered input windows + the
        # double-buffered output slab.
        bytes_per_row = itemsize * (2 * n_sel * out_len + 2 * n_out * out_len)
        tile_r = _pick_row_tile(R, bytes_per_row)
        n_rt = R // tile_r
        kernel = functools.partial(_windowed_copy_kernel,
                                   n_sel=n_sel, label=label)
        in_specs = [
            pl.BlockSpec((tile_r, out_len), lambda r, b=s // out_len: (r, b))
            for s in starts
        ]
        operands = (x2d,) * n_sel
    else:
        # General path: resident row slab + static slices.
        bytes_per_row = itemsize * (2 * total_length + 2 * n_out * out_len)
        tile_r = _pick_row_tile(R, bytes_per_row)
        n_rt = R // tile_r
        kernel = functools.partial(_resident_copy_kernel, starts=starts,
                                   out_len=out_len, label=label)
        in_specs = [pl.BlockSpec((tile_r, total_length), lambda r: (r, 0))]
        operands = (x2d,)

    out = pl.pallas_call(
        kernel,
        out_shape=jax.ShapeDtypeStruct((n_out, R, out_len), x.dtype),
        grid=(n_rt,),
        in_specs=in_specs,
        out_specs=pl.BlockSpec((n_out, tile_r, out_len), lambda r: (0, r, 0)),
        compiler_params=pltpu.CompilerParams(
            dimension_semantics=("parallel",)),   # row tiles -> v7x 2-TC shard
    )(*operands)

    return out.reshape((n_out,) + lead_shape + (out_len,))


def _reference(x, chunk_order, label, sampling_rate=None, chunk_size=None,
               number_of_chunks=None):
    """Pure-JAX reference mirroring the PyTorch forward (for verification)."""
    total_length = x.shape[-1]
    sr, cs = sampling_rate, chunk_size
    if sr is None and cs is None:
        sr = 1
        cs = math.ceil(total_length / number_of_chunks)
    if cs is None and sr is not None:
        cs = math.ceil(total_length / (number_of_chunks * sr))
    elif sr is None and cs is not None:
        sr = math.ceil(total_length / (number_of_chunks * cs))
    chunks = []
    for i in chunk_order:
        end = min(total_length, int((i + 1) * cs * sr))
        start = max(0, end - int(cs * sr))
        chunks.append(x[..., start:end])
    chunks.append(jnp.full(chunks[0].shape, label, dtype=x.dtype))
    return jnp.stack(chunks)


if __name__ == "__main__":
    k1, k2, k3 = jax.random.split(jax.random.PRNGKey(0), 3)

    # 1) Waveform batch, evenly divisible chunks -> aligned windowed-DMA path.
    x1 = jax.random.normal(k1, (2, 512), dtype=jnp.float32)
    order1, label1, nchunks1 = [2, 0, 3, 1], 7, 4
    out1 = jax.block_until_ready(
        chunk_shuffle_label(x1, order1, label1, number_of_chunks=nchunks1))
    ref1 = _reference(x1, order1, label1, number_of_chunks=nchunks1)
    assert out1.shape == ref1.shape == (5, 2, 128), out1.shape
    np.testing.assert_array_equal(np.asarray(out1), np.asarray(ref1))

    # 2) Ragged case (T not a multiple of the chunk length, short last chunk)
    #    -> general resident-row path (exercises the edge-case fixes).
    x2 = jax.random.normal(k2, (3, 200), dtype=jnp.float32)
    order2, label2, nchunks2 = [1, 2, 0], 3, 3
    out2 = jax.block_until_ready(
        chunk_shuffle_label(x2, order2, label2, number_of_chunks=nchunks2))
    ref2 = _reference(x2, order2, label2, number_of_chunks=nchunks2)
    assert out2.shape == ref2.shape == (4, 3, 67), out2.shape
    np.testing.assert_array_equal(np.asarray(out2), np.asarray(ref2))

    # 3) Spectrogram-like 4-D input (batch, channels, n_freq, n_time).
    x3 = jax.random.normal(k3, (2, 4, 16, 256), dtype=jnp.float32)
    order3, label3, nchunks3 = [1, 0], 1, 2
    out3 = jax.block_until_ready(
        chunk_shuffle_label(x3, order3, label3, number_of_chunks=nchunks3))
    ref3 = _reference(x3, order3, label3, number_of_chunks=nchunks3)
    assert out3.shape == ref3.shape == (3, 2, 4, 16, 128), out3.shape
    np.testing.assert_array_equal(np.asarray(out3), np.asarray(ref3))

    print("KERNEL_OK")
</pallas_src>

<mosaic_0001>
module attributes {stable_mosaic.version = 11 : i64} {
  func.func @_windowed_copy_kernel(%arg0: i32, %arg1: memref<2x128xf32, #tpu.memory_space<vmem>>, %arg2: memref<2x128xf32, #tpu.memory_space<vmem>>, %arg3: memref<2x128xf32, #tpu.memory_space<vmem>>, %arg4: memref<2x128xf32, #tpu.memory_space<vmem>>, %arg5: memref<5x2x128xf32, #tpu.memory_space<vmem>>) attributes {dimension_semantics = [#tpu.dimension_semantics<parallel>], iteration_bounds = array<i64: 1>, scalar_prefetch = 0 : i64, scratch_operands = 0 : i64, tpu.core_type = #tpu.core_type<tc>, window_params = [{transform_indices = @transform_0, window_bounds = array<i64: 2, 128>}, {transform_indices = @transform_1, window_bounds = array<i64: 2, 128>}, {transform_indices = @transform_2, window_bounds = array<i64: 2, 128>}, {transform_indices = @transform_3, window_bounds = array<i64: 2, 128>}, {transform_indices = @transform_4, window_bounds = array<i64: 5, 2, 128>}]} {
    %c0 = arith.constant 0 : index
    %c0_0 = arith.constant 0 : index
    %0 = vector.load %arg1[%c0, %c0_0] : memref<2x128xf32, #tpu.memory_space<vmem>>, vector<2x128xf32>
    %c0_1 = arith.constant 0 : index
    %c0_2 = arith.constant 0 : index
    %c0_3 = arith.constant 0 : index
    %1 = vector.load %arg5[%c0_1, %c0_2, %c0_3] : memref<5x2x128xf32, #tpu.memory_space<vmem>>, vector<1x2x128xf32>
    %2 = vector.shape_cast %1 : vector<1x2x128xf32> to vector<2x128xf32>
    %3 = vector.shape_cast %0 : vector<2x128xf32> to vector<1x2x128xf32>
    tpu.vector_store %arg5[%c0_1, %c0_2, %c0_3], %3 {strides = array<i32>} : memref<5x2x128xf32, #tpu.memory_space<vmem>>, vector<1x2x128xf32>,
    %c0_4 = arith.constant 0 : index
    %c0_5 = arith.constant 0 : index
    %4 = vector.load %arg2[%c0_4, %c0_5] : memref<2x128xf32, #tpu.memory_space<vmem>>, vector<2x128xf32>
    %c1 = arith.constant 1 : index
    %c0_6 = arith.constant 0 : index
    %c0_7 = arith.constant 0 : index
    %5 = vector.load %arg5[%c1, %c0_6, %c0_7] : memref<5x2x128xf32, #tpu.memory_space<vmem>>, vector<1x2x128xf32>
    %6 = vector.shape_cast %5 : vector<1x2x128xf32> to vector<2x128xf32>
    %7 = vector.shape_cast %4 : vector<2x128xf32> to vector<1x2x128xf32>
    tpu.vector_store %arg5[%c1, %c0_6, %c0_7], %7 {strides = array<i32>} : memref<5x2x128xf32, #tpu.memory_space<vmem>>, vector<1x2x128xf32>,
    %c0_8 = arith.constant 0 : index
    %c0_9 = arith.constant 0 : index
    %8 = vector.load %arg3[%c0_8, %c0_9] : memref<2x128xf32, #tpu.memory_space<vmem>>, vector<2x128xf32>
    %c2 = arith.constant 2 : index
    %c0_10 = arith.constant 0 : index
    %c0_11 = arith.constant 0 : index
    %9 = vector.load %arg5[%c2, %c0_10, %c0_11] : memref<5x2x128xf32, #tpu.memory_space<vmem>>, vector<1x2x128xf32>
    %10 = vector.shape_cast %9 : vector<1x2x128xf32> to vector<2x128xf32>
    %11 = vector.shape_cast %8 : vector<2x128xf32> to vector<1x2x128xf32>
    tpu.vector_store %arg5[%c2, %c0_10, %c0_11], %11 {strides = array<i32>} : memref<5x2x128xf32, #tpu.memory_space<vmem>>, vector<1x2x128xf32>,
    %c0_12 = arith.constant 0 : index
    %c0_13 = arith.constant 0 : index
    %12 = vector.load %arg4[%c0_12, %c0_13] : memref<2x128xf32, #tpu.memory_space<vmem>>, vector<2x128xf32>
    %c3 = arith.constant 3 : index
    %c0_14 = arith.constant 0 : index
    %c0_15 = arith.constant 0 : index
    %13 = vector.load %arg5[%c3, %c0_14, %c0_15] : memref<5x2x128xf32, #tpu.memory_space<vmem>>, vector<1x2x128xf32>
    %14 = vector.shape_cast %13 : vector<1x2x128xf32> to vector<2x128xf32>
    %15 = vector.shape_cast %12 : vector<2x128xf32> to vector<1x2x128xf32>
    tpu.vector_store %arg5[%c3, %c0_14, %c0_15], %15 {strides = array<i32>} : memref<5x2x128xf32, #tpu.memory_space<vmem>>, vector<1x2x128xf32>,
    %cst = arith.constant 7.000000e+00 : f32
    %16 = vector.broadcast %cst : f32 to vector<2x128xf32>
    %c4 = arith.constant 4 : index
    %c0_16 = arith.constant 0 : index
    %c0_17 = arith.constant 0 : index
    %17 = vector.load %arg5[%c4, %c0_16, %c0_17] : memref<5x2x128xf32, #tpu.memory_space<vmem>>, vector<1x2x128xf32>
    %18 = vector.shape_cast %17 : vector<1x2x128xf32> to vector<2x128xf32>
    %19 = vector.shape_cast %16 : vector<2x128xf32> to vector<1x2x128xf32>
    tpu.vector_store %arg5[%c4, %c0_16, %c0_17], %19 {strides = array<i32>} : memref<5x2x128xf32, #tpu.memory_space<vmem>>, vector<1x2x128xf32>,
    return
  }
  func.func @transform_0(%arg0: i32) -> (i32, i32) {
    %c2_i32 = arith.constant 2 : i32
    %c0_i32 = arith.constant 0 : i32
    return %arg0, %c2_i32 : i32, i32
  }
  func.func @transform_1(%arg0: i32) -> (i32, i32) {
    %c0_i32 = arith.constant 0 : i32
    %c0_i32_0 = arith.constant 0 : i32
    return %arg0, %c0_i32 : i32, i32
  }
  func.func @transform_2(%arg0: i32) -> (i32, i32) {
    %c3_i32 = arith.constant 3 : i32
    %c0_i32 = arith.constant 0 : i32
    return %arg0, %c3_i32 : i32, i32
  }
  func.func @transform_3(%arg0: i32) -> (i32, i32) {
    %c1_i32 = arith.constant 1 : i32
    %c0_i32 = arith.constant 0 : i32
    return %arg0, %c1_i32 : i32, i32
  }
  func.func @transform_4(%arg0: i32) -> (i32, i32, i32) {
    %c0_i32 = arith.constant 0 : i32
    %c0_i32_0 = arith.constant 0 : i32
    %c0_i32_1 = arith.constant 0 : i32
    return %c0_i32, %arg0, %c0_i32_0 : i32, i32, i32
  }
}

</mosaic_0001>

<bundles_post_ra>
// kernel: tpu_custom_call.1
= control target key start
LH: loop header
LB: loop body
LE: loop exit
PB: predicated region body
PF: predicated region fallthrough
CT: control target
= control target key end

     0   :  { %9 = vsyncpa [#allocation3], 0  ;;  %s286_s0 = inlined_call_operand.hbm [shape: f32[2,512], index: 0, kind: input, shape index: {}]   ;;  %s287_s1 = inlined_call_operand.hbm [shape: f32[2,512], index: 1, kind: input, shape index: {}]   ;;  %s288_s2 = inlined_call_operand.hbm [shape: f32[2,512], index: 2, kind: input, shape index: {}]   ;;  %s289_s3 = inlined_call_operand.vmem [shape: f32[2,512], index: 3, kind: input, shape index: {}]   ;;  %s290_s4 = inlined_call_operand.hbm [shape: f32[5,2,128], index: 4, kind: output, shape index: {}]  }
   0x1   :  { %10 = vsyncpa [#allocation6], 0 }
   0x2   :  { %11 = vsyncpa [#allocation4], 0  ;;  %s232_s17 = scalar_lea.hbm %s286_s0, 64  ;;  %s197_s18 = smov [#allocation5]  }
   0x3   :  { %s29_s19 = sshll.u32 %s197_s18, 4  ;;  %s198_s20 = smov [#allocation2]   ;;  %s30_s19 = int_to_ptr.vmem [resolvable:$true] %s29_s19 }
   0x4   :  { %s19_s21 = sshll.u32 %s198_s20, 4  ;;  %s97_s24 = scalar_lea.hbm %s287_s1, 32  ;;  %s20_s21 = int_to_ptr.vmem [resolvable:$true] %s19_s21 }
   0x5   :  { %p98_p0 = scmp.ne.s32.totalorder %s287_s1, %s97_s24  ;;  %s99_s29 = scalar_lea.hbm %s287_s1, 128 }
   0x6   :  { %p100_p1 = scmp.lt.u32.totalorder %s99_s29, %s97_s24  ;;  %p101_p2 = scmp.lt.u32.totalorder %s97_s24, %s287_s1 }
   0x8   :  { %p102_p3 = por %p101_p2, %p100_p1 }
   0xa   :  { %p103_p4 = pnand %p102_p3, %p98_p0 }
   0xc   :  { %106 = shalt.err (!%p103_p4)
}
   0xd   :  { %s107_s6 = scalar_lea.vmem %s30_s19, 32  ;;  %p112_p6 = scmp.lt.s32.totalorder %s30_s19, %s30_s19 }
   0xe   :  { %p108_p5 = scmp.ne.s32.totalorder %s30_s19, %s107_s6  ;;  %p113_p7 = scmp.lt.s32.totalorder %s107_s6, %s107_s6 }
  0x10   :  { %p114_p8 = por %p113_p7, %p112_p6 }
  0x12   :  { %p115_p9 = pnand %p114_p8, %p108_p5 }
  0x14   :  { %118 = shalt.err (!%p115_p9)
}
  0x15   :  { %32 = dma.hbm_to_vmem [thread:$0]  %s287_s1, 32, %s30_s19, [#allocation6]  }
  0x16   :  { %s143_s11 = scalar_lea.hbm %s286_s0, 96  ;;  %s121_s14 = scalar_lea.hbm %s286_s0, 128 }
  0x17   :  { %p120_p10 = scmp.ne.s32.totalorder %s232_s17, %s143_s11  ;;  %p122_p11 = scmp.lt.u32.totalorder %s232_s17, %s286_s0 }
  0x18   :  { %p123_p12 = scmp.lt.u32.totalorder %s121_s14, %s143_s11  ;;  %p125_p0 = scmp.lt.u32.totalorder %s143_s11, %s232_s17 }
  0x1a   :  { %p124_p13 = por %p123_p12, %p122_p11 }
  0x1c   :  { %p126_p1 = por %p125_p0, %p124_p13 }
  0x1e   :  { %p127_p2 = pnand %p126_p1, %p120_p10 }
  0x20   :  { %130 = shalt.err (!%p127_p2)
}
  0x21   :  { %s131_s1 = scalar_lea.vmem %s20_s21, 32  ;;  %p136_p4 = scmp.lt.s32.totalorder %s20_s21, %s20_s21 }
  0x22   :  { %p132_p3 = scmp.ne.s32.totalorder %s20_s21, %s131_s1  ;;  %p137_p5 = scmp.lt.s32.totalorder %s131_s1, %s131_s1 }
  0x24   :  { %p138_p6 = por %p137_p5, %p136_p4 }
  0x26   :  { %p139_p7 = pnand %p138_p6, %p132_p3 }
  0x28   :  { %142 = shalt.err (!%p139_p7)
}
  0x29   :  { %22 = dma.hbm_to_vmem [thread:$0]  %s232_s17, 32, %s20_s21, [#allocation3]  }
  0x2a   :  { %s38_s20 = scalar_lea.hbm %s288_s2, 96  ;;  %s199_s0 = smov [#allocation7]  }
  0x2b   :  { %s40_s22 = sshll.u32 %s199_s0, 4  ;;  %s168_s25 = scalar_lea.hbm %s288_s2, 128  ;;  %s41_s22 = int_to_ptr.vmem [resolvable:$true] %s40_s22 }
  0x2c   :  { %p145_p8 = scmp.ne.s32.totalorder %s38_s20, %s168_s25  ;;  %p147_p9 = scmp.lt.u32.totalorder %s38_s20, %s288_s2 }
  0x2d   :  { %p148_p10 = scmp.lt.u32.totalorder %s168_s25, %s168_s25  ;;  %p150_p12 = scmp.lt.u32.totalorder %s168_s25, %s38_s20 }
  0x2f   :  { %p149_p11 = por %p148_p10, %p147_p9 }
  0x31   :  { %p151_p13 = por %p150_p12, %p149_p11 }
  0x33   :  { %p152_p0 = pnand %p151_p13, %p145_p8 }
  0x35   :  { %155 = shalt.err (!%p152_p0)
}
  0x36   :  { %s156_s17 = scalar_lea.vmem %s41_s22, 32  ;;  %p161_p2 = scmp.lt.s32.totalorder %s41_s22, %s41_s22 }
  0x37   :  { %p157_p1 = scmp.ne.s32.totalorder %s41_s22, %s156_s17  ;;  %p162_p3 = scmp.lt.s32.totalorder %s156_s17, %s156_s17 }
  0x39   :  { %p163_p4 = por %p162_p3, %p161_p2 }
  0x3b   :  { %p164_p5 = pnand %p163_p4, %p157_p1 }
  0x3d   :  { %167 = shalt.err (!%p164_p5)
}
  0x3e   :  { %43 = dma.hbm_to_vmem [thread:$0]  %s38_s20, 32, %s41_s22, [#allocation6]  }
  0x3f   :  { %191 = dma.done.wait [#allocation3], 32  }
  0x40   :  { %192 = vsyncadd [#allocation3], 4294967264 }
  0x41   :  { %193 = dma.done.wait [#allocation6], 64  }
  0x42   :  { %194 = vsyncadd [#allocation6], 4294967232  ;;  %v200_v0 = vmov 7.0   ;;  %s201_s2 = smov [#allocation8]   ;;  %v58_v1 = vld [vmem:[#allocation2] sm:$0x3] }
  0x43   :  { %70 = vst [vmem:[#allocation8 + $0x8] sm:$0x3] %v200_v0  ;;  %s76_s21 = sshll.u32 %s201_s2, 4  ;;  %v60_v2 = vld [vmem:[#allocation5] sm:$0x3]  ;;  %s77_s21 = int_to_ptr.vmem [resolvable:$true] %s76_s21 }
  0x44   :  { %v63_v3 = vld [vmem:[#allocation7] sm:$0x3]  ;;  %59 = vst [vmem:[#allocation8] sm:$0x3] %v58_v1  ;;  %62 = vst [vmem:[#allocation8 + $0x2] sm:$0x3] %v60_v2  ;;  %p174_p7 = scmp.lt.s32.totalorder %s77_s21, %s77_s21 }
  0x45   :  { %65 = vst [vmem:[#allocation8 + $0x4] sm:$0x3] %v63_v3  ;;  %v89_v4 = vld [vmem:[%s289_s3 + $0x2] sm:$0x3]  ;;  %s169_s30 = scalar_lea.vmem %s77_s21, 160 }
  0x46   :  { %68 = vst [vmem:[#allocation8 + $0x6] sm:$0x3] %v89_v4  ;;  %p170_p6 = scmp.ne.s32.totalorder %s77_s21, %s169_s30  ;;  %p175_p8 = scmp.lt.s32.totalorder %s169_s30, %s169_s30 }
  0x48   :  { %p176_p9 = por %p175_p8, %p174_p7 }
  0x4a   :  { %p177_p10 = pnand %p176_p9, %p170_p6 }
  0x4c   :  { %180 = shalt.err (!%p177_p10)
}
  0x4d   :  { %s181_s7 = scalar_lea.hbm %s290_s4, 160 }
  0x4e   :  { %p182_p11 = scmp.ne.s32.totalorder %s290_s4, %s181_s7  ;;  %p185_p12 = scmp.lt.u32.totalorder %s181_s7, %s290_s4 }
  0x50   :  { %p187_p13 = pnand %p185_p12, %p182_p11 }
  0x52   :  { %190 = shalt.err (!%p187_p13)
}
  0x53   :  { %s202_s3 = smov 32   ;;  %s203_s12 = smov 2  }
  0x54   :  { %82 = dma.vmem_to_hbm [thread:$0]  %s77_s21, 160, %s290_s4, [#allocation4], %s202_s3, %s202_s3, %s203_s12  }
  0x55   :  { %195 = dma.done.wait [#allocation4], 160  }
  0x56   :  { %196 = vsyncadd [#allocation4], 4294967136 }
  0x57   :  { %86 = vsyncpa [#allocation3], 1 }
  0x58   :  { %87 = vsyncpa [#allocation6], 1 }
  0x59   :  { %88 = vsyncpa [#allocation4], 1 }

</bundles_post_ra>
